<compile_context>
chip_gen: v6e
topology: v6e:2x2x1
jax: 0.10.0
libtpu: 0.0.40
codegen_flags: <defaults>
</compile_context>

<pallas_src>
import jax
import jax.numpy as jnp
from jax import lax
from jax.experimental import pallas as pl
from jax.experimental.pallas import tpu as pltpu


_SQRT_HALF = 0.7071067811865476


def _round_up(x, m):
    return (x + m - 1) // m * m


def _vmem_capacity_bytes():
    """Generation-gated VMEM size (128 MiB on v5e/v6e, 64 MiB per core on v7x)."""
    try:
        return int(pltpu.get_tpu_info().vmem_capacity_bytes)
    except Exception:
        return 64 * 1024 * 1024   # conservative fallback (v7x-sized)


def _clamp_vmem(working_set_bytes, vmem_cap):
    """Scoped-VMEM limit: actual working set + headroom, capped below physical."""
    return int(min(int(vmem_cap * 0.92),
                   max(int(working_set_bytes) + (8 << 20), 32 << 20)))


def _gelu_exact(z):
    # exact GELU (matches torch.nn.GELU default): 0.5*z*(1+erf(z/sqrt(2)))
    return 0.5 * z * (1.0 + lax.erf(z * jnp.float32(_SQRT_HALF)))


# ----------------------------------------------------------------------------
# GCN symmetric normalization with self loops -> dense adjacency, built
# DIRECTLY in the aggregation dtype (no extra N^2 cast pass).
# (matches torch_geometric gcn_norm for the default unweighted case:
#  add_remaining_self_loops -> existing self-loops replaced by one weight-1
#  self-loop per node; with user edge_weight PyG would keep the original
#  self-loop weight and this helper would diverge.)
# ----------------------------------------------------------------------------
def gcn_norm_dense(edge_index, num_nodes, num_nodes_padded=None,
                   dtype=jnp.float32):
    if num_nodes_padded is None:
        num_nodes_padded = num_nodes
    src, dst = edge_index[0], edge_index[1]
    w = jnp.where(src != dst, 1.0, 0.0).astype(jnp.float32)
    loop = jnp.arange(num_nodes, dtype=edge_index.dtype)
    src = jnp.concatenate([src, loop])
    dst = jnp.concatenate([dst, loop])
    w = jnp.concatenate([w, jnp.ones((num_nodes,), jnp.float32)])
    deg = jnp.zeros((num_nodes_padded,), jnp.float32).at[dst].add(w)
    dinv = jnp.where(deg > 0, lax.rsqrt(deg), jnp.zeros_like(deg))
    norm = (dinv[src] * w * dinv[dst]).astype(dtype)
    # A[dst, src] = norm  so that  out = A @ x aggregates sources into targets
    a = jnp.zeros((num_nodes_padded, num_nodes_padded), dtype)
    return a.at[dst, src].add(norm)


# ----------------------------------------------------------------------------
# Small-graph path (n <= 512): one fused kernel.
#   H = X @ W is computed into VMEM (W resident), then GELU(A @ H + b) + X.
# ----------------------------------------------------------------------------
def _make_fused_kernel(tm, agg_dtype):
    def kernel(a_ref, x_ref, w_ref, b_ref, o_ref):
        i = pl.program_id(0)
        # H = X @ W entirely in VMEM (recomputed per dst-row tile; O(N*C^2) is
        # negligible next to the O(N^2*C) aggregation at these sizes).
        h = jnp.dot(x_ref[...].astype(agg_dtype), w_ref[...],
                    preferred_element_type=jnp.float32).astype(agg_dtype)
        z = jnp.dot(a_ref[...], h, preferred_element_type=jnp.float32)
        z = z + b_ref[...]
        g = _gelu_exact(z)
        # dropout = identity (eval mode), then residual from the resident X
        row0 = pl.multiple_of(i * tm, 8)
        xres = x_ref[pl.ds(row0, tm), :].astype(jnp.float32)
        o_ref[...] = (g + xres).astype(o_ref.dtype)
    return kernel


# ----------------------------------------------------------------------------
# Large-graph path kernel 1:  H = X @ W  (computed once, bf16-fed MXU)
# ----------------------------------------------------------------------------
def _make_xw_kernel(agg_dtype):
    def kernel(x_ref, w_ref, h_ref):
        x = x_ref[...].astype(agg_dtype)          # feed the MXU in agg dtype
        h_ref[...] = jnp.dot(x, w_ref[...],
                             preferred_element_type=jnp.float32).astype(agg_dtype)
    return kernel


def _compute_h(x_pad, w_pad, agg_dtype, tm, vmem_limit):
    n_pad, c_pad = x_pad.shape
    return pl.pallas_call(
        _make_xw_kernel(agg_dtype),
        out_shape=jax.ShapeDtypeStruct((n_pad, c_pad), agg_dtype),
        grid=(n_pad // tm,),
        in_specs=[
            pl.BlockSpec((tm, c_pad), lambda i: (i, 0)),      # X row tile
            pl.BlockSpec((c_pad, c_pad), lambda i: (0, 0)),   # W (resident)
        ],
        out_specs=pl.BlockSpec((tm, c_pad), lambda i: (i, 0)),
        compiler_params=pltpu.CompilerParams(
            dimension_semantics=("parallel",),
            vmem_limit_bytes=vmem_limit),
        cost_estimate=pl.CostEstimate(
            flops=2 * n_pad * c_pad * c_pad,
            transcendentals=0,
            bytes_accessed=(x_pad.size * x_pad.dtype.itemsize
                            + w_pad.size * w_pad.dtype.itemsize
                            + n_pad * c_pad * jnp.dtype(agg_dtype).itemsize)),
    )(x_pad, w_pad)


# ----------------------------------------------------------------------------
# Large-graph path kernel 2:  out = GELU(A @ H + b) + X_residual
#   grid = (dst-row tiles [parallel], src tiles [arbitrary, reduction last])
#   H is either fully VMEM-resident (sliced in-kernel) or tiled per-k.
# ----------------------------------------------------------------------------
def _make_agg_kernel(tk, h_resident):
    def kernel(a_ref, h_ref, b_ref, xres_ref, o_ref, acc_ref):
        k = pl.program_id(1)

        @pl.when(k == 0)
        def _():
            acc_ref[...] = jnp.zeros_like(acc_ref)

        if h_resident:
            # H lives fully in VMEM; slice the current K chunk (no HBM re-fetch).
            h_tile = h_ref[pl.ds(pl.multiple_of(k * tk, 256), tk), :]
        else:
            h_tile = h_ref[...]

        acc_ref[...] += jnp.dot(a_ref[...], h_tile,
                                preferred_element_type=jnp.float32)

        @pl.when(k == pl.num_programs(1) - 1)
        def _():
            z = acc_ref[...] + b_ref[...]
            g = _gelu_exact(z)
            # dropout = identity (eval mode), then residual
            o_ref[...] = (g + xres_ref[...].astype(jnp.float32)).astype(o_ref.dtype)

    return kernel


def _choose_tiles(n_pad, c_pad, agg_bytes, x_bytes, out_bytes, budget):
    """Pick (tm, tk) maximizing tile area (fewest grid steps) under the VMEM
    budget, keeping >=2 dst-row tiles so dual-TensorCore chips can split i."""
    h_full_bytes = n_pad * c_pad * agg_bytes
    h_resident = 2 * h_full_bytes <= min(budget // 4, 32 * 1024 * 1024)

    def working_set(tm, tk):
        ws = 2 * tm * tk * agg_bytes                       # double-buffered A
        ws += 2 * h_full_bytes if h_resident else 2 * tk * c_pad * agg_bytes
        ws += tm * c_pad * 4                               # f32 accumulator
        ws += 2 * tm * c_pad * x_bytes                     # residual tiles
        ws += 2 * tm * c_pad * out_bytes                   # output tiles
        ws += 2 * c_pad * 4                                # bias
        return ws

    candidates = [t for t in (2048, 1536, 1024, 768, 512) if n_pad % t == 0]
    tm_min = min(candidates)
    best = (tm_min, tm_min)
    best_steps = (n_pad // tm_min) * (n_pad // tm_min)
    for tm in candidates:
        if n_pad // tm < 2 and tm != tm_min:
            continue   # keep >=2 dst-row tiles for megacore splitting
        for tk in candidates:
            if working_set(tm, tk) > budget:
                continue
            steps = (n_pad // tm) * (n_pad // tk)
            if steps < best_steps:
                best_steps, best = steps, (tm, tk)
    tm, tk = best
    return tm, tk, h_resident, working_set(tm, tk)


# ----------------------------------------------------------------------------
# Module wrapper ('gcn' branch of AugGraphConv; node_type / edge_type unused
# by this branch, kept in the signature for forward-pass fidelity).
# ----------------------------------------------------------------------------
def aug_graph_conv_forward(x_inp, node_type, edge_index, edge_type, params,
                           *, agg_dtype=jnp.bfloat16):
    del node_type, edge_type  # unused by the 'gcn' branch
    n, c_in = x_inp.shape
    weight = params["weight"].astype(jnp.float32)
    bias = params["bias"].astype(jnp.float32)
    c_out = weight.shape[1]
    assert c_in == c_out, "residual connection requires in_channels == out_channels"
    out_dtype = x_inp.dtype

    agg_bytes = jnp.dtype(agg_dtype).itemsize
    x_bytes = jnp.dtype(x_inp.dtype).itemsize
    out_bytes = jnp.dtype(out_dtype).itemsize

    # Lane-dense channel padding; 256-multiple once the aggregation becomes
    # compute-bound (full 256-wide MXU on v6e/v7x), 128 for small/mem-bound C.
    c_pad = _round_up(c_out, 256) if c_out >= 320 else _round_up(c_out, 128)

    vmem_cap = _vmem_capacity_bytes()
    budget = int(vmem_cap * 0.70)

    b_pad = jnp.zeros((1, c_pad), jnp.float32).at[0, :c_out].set(bias)
    w_pad = jnp.zeros((c_pad, c_pad), agg_dtype).at[:c_in, :c_out].set(
        weight.astype(agg_dtype))

    # ------------------------------------------------------------------ small
    if n <= 512:
        n_pad = _round_up(n, 128)
        # >=2 dst-row tiles when possible so v7x's two TensorCores both work.
        tm = n_pad // 2 if n_pad >= 256 else n_pad
        x_pad = jnp.zeros((n_pad, c_pad), x_inp.dtype).at[:n, :c_in].set(x_inp)
        a_norm = gcn_norm_dense(edge_index, n, n_pad, dtype=agg_dtype)

        ws = (2 * tm * n_pad * agg_bytes            # A row tiles
              + 2 * n_pad * c_pad * x_bytes         # resident X
              + 2 * c_pad * c_pad * agg_bytes       # resident W
              + 2 * tm * c_pad * out_bytes          # output tiles
              + 2 * n_pad * c_pad * 4)              # in-kernel H / temporaries

        out_pad = pl.pallas_call(
            _make_fused_kernel(tm, agg_dtype),
            out_shape=jax.ShapeDtypeStruct((n_pad, c_pad), out_dtype),
            grid=(n_pad // tm,),
            in_specs=[
                pl.BlockSpec((tm, n_pad), lambda i: (i, 0)),      # A row tile
                pl.BlockSpec((n_pad, c_pad), lambda i: (0, 0)),   # X (resident)
                pl.BlockSpec((c_pad, c_pad), lambda i: (0, 0)),   # W (resident)
                pl.BlockSpec((1, c_pad), lambda i: (0, 0)),       # bias
            ],
            out_specs=pl.BlockSpec((tm, c_pad), lambda i: (i, 0)),
            compiler_params=pltpu.CompilerParams(
                dimension_semantics=("parallel",),
                vmem_limit_bytes=_clamp_vmem(ws, vmem_cap)),
            cost_estimate=pl.CostEstimate(
                flops=2 * n_pad * n_pad * c_pad
                      + 2 * n_pad * c_pad * c_pad * (n_pad // tm),
                transcendentals=n_pad * c_pad,
                bytes_accessed=n_pad * n_pad * agg_bytes
                               + n_pad * c_pad * (x_bytes + out_bytes)
                               + c_pad * c_pad * agg_bytes),
        )(a_norm, x_pad, w_pad, b_pad)
        return out_pad[:n, :c_out]

    # ------------------------------------------------------------------ large
    n_pad = _round_up(n, 512)
    tm, tk, h_resident, ws = _choose_tiles(n_pad, c_pad, agg_bytes, x_bytes,
                                           out_bytes, budget)
    x_pad = jnp.zeros((n_pad, c_pad), x_inp.dtype).at[:n, :c_in].set(x_inp)
    a_norm = gcn_norm_dense(edge_index, n, n_pad, dtype=agg_dtype)

    # H = X @ W (computed once, bf16-fed MXU, emitted in agg_dtype)
    tm_h = 512
    ws_xw = (2 * tm_h * c_pad * x_bytes + 2 * c_pad * c_pad * agg_bytes
             + 2 * tm_h * c_pad * agg_bytes)
    h = _compute_h(x_pad, w_pad, agg_dtype, tm_h, _clamp_vmem(ws_xw, vmem_cap))

    h_spec = (pl.BlockSpec((n_pad, c_pad), lambda i, k: (0, 0)) if h_resident
              else pl.BlockSpec((tk, c_pad), lambda i, k: (k, 0)))

    out_pad = pl.pallas_call(
        _make_agg_kernel(tk, h_resident),
        out_shape=jax.ShapeDtypeStruct((n_pad, c_pad), out_dtype),
        grid=(n_pad // tm, n_pad // tk),
        in_specs=[
            pl.BlockSpec((tm, tk), lambda i, k: (i, k)),        # A tile
            h_spec,                                             # H (resident/tiled)
            pl.BlockSpec((1, c_pad), lambda i, k: (0, 0)),      # bias (resident)
            pl.BlockSpec((tm, c_pad), lambda i, k: (i, 0)),     # residual X tile
        ],
        out_specs=pl.BlockSpec((tm, c_pad), lambda i, k: (i, 0)),
        scratch_shapes=[pltpu.VMEM((tm, c_pad), jnp.float32)],
        compiler_params=pltpu.CompilerParams(
            dimension_semantics=("parallel", "arbitrary"),
            vmem_limit_bytes=_clamp_vmem(ws, vmem_cap)),
        cost_estimate=pl.CostEstimate(
            flops=2 * n_pad * n_pad * c_pad,
            transcendentals=n_pad * c_pad,
            bytes_accessed=n_pad * n_pad * agg_bytes
                           + n_pad * c_pad * (agg_bytes + x_bytes + out_bytes)
                           + c_pad * 4),
    )(a_norm, h, b_pad, x_pad)
    return out_pad[:n, :c_out]


# ----------------------------------------------------------------------------
# Pure-JAX reference for verification
# ----------------------------------------------------------------------------
def reference_forward(x_inp, edge_index, params):
    a = gcn_norm_dense(edge_index, x_inp.shape[0], dtype=jnp.float32)
    z = a @ (x_inp @ params["weight"]) + params["bias"][None, :]
    g = jax.nn.gelu(z, approximate=False)
    return g + x_inp


def _run_case(key, n, c, e, label):
    k_x, k_e, k_w, k_b = jax.random.split(key, 4)
    x_inp = jax.random.normal(k_x, (n, c), dtype=jnp.float32)
    edge_index = jax.random.randint(k_e, (2, e), 0, n, dtype=jnp.int32)
    node_type = jnp.zeros((n,), dtype=jnp.int32)   # unused by 'gcn' branch
    edge_type = jnp.zeros((e,), dtype=jnp.int32)   # unused by 'gcn' branch
    params = {
        "weight": (jax.random.normal(k_w, (c, c), dtype=jnp.float32)
                   * (1.0 / jnp.sqrt(jnp.float32(c)))),
        "bias": jax.random.normal(k_b, (c,), dtype=jnp.float32) * 0.1,
    }
    ref = reference_forward(x_inp, edge_index, params)

    # f32 aggregation path (tight-precision check).
    out_f32 = aug_graph_conv_forward(x_inp, node_type, edge_index, edge_type,
                                     params, agg_dtype=jnp.float32)
    out_f32 = jax.block_until_ready(out_f32)
    assert out_f32.shape == (n, c)
    assert jnp.allclose(out_f32, ref, atol=2e-4, rtol=2e-4), (
        f"{label} f32 path max abs err {jnp.max(jnp.abs(out_f32 - ref))}")

    # Default bf16-fed MXU path (f32 accumulation) — loose tolerance.
    out_bf16 = aug_graph_conv_forward(x_inp, node_type, edge_index, edge_type,
                                      params, agg_dtype=jnp.bfloat16)
    out_bf16 = jax.block_until_ready(out_bf16)
    assert out_bf16.shape == (n, c)
    assert jnp.allclose(out_bf16, ref, atol=5e-2, rtol=5e-2), (
        f"{label} bf16 path max abs err {jnp.max(jnp.abs(out_bf16 - ref))}")


if __name__ == "__main__":
    key = jax.random.PRNGKey(0)
    k_small, k_large = jax.random.split(key)
    # Small graph: fused single-kernel path (16 nodes, 32 channels, 40 edges).
    _run_case(k_small, 16, 32, 40, "small")
    # Larger graph: hoisted-XW + tiled aggregation path with resident H.
    _run_case(k_large, 700, 64, 2800, "large")
    print("KERNEL_OK")
</pallas_src>

<mosaic_0001>
module attributes {stable_mosaic.version = 11 : i64} {
  func.func @kernel(%arg0: i32, %arg1: memref<128x128xf32, #tpu.memory_space<vmem>>, %arg2: memref<128x128xf32, #tpu.memory_space<vmem>>, %arg3: memref<128x128xf32, #tpu.memory_space<vmem>>, %arg4: memref<1x128xf32, #tpu.memory_space<vmem>>, %arg5: memref<128x128xf32, #tpu.memory_space<vmem>>) attributes {dimension_semantics = [#tpu.dimension_semantics<parallel>], iteration_bounds = array<i64: 1>, scalar_prefetch = 0 : i64, scratch_operands = 0 : i64, tpu.core_type = #tpu.core_type<tc>, window_params = [{transform_indices = @transform_0, window_bounds = array<i64: 128, 128>}, {pipeline_mode = #tpu.pipeline_mode<synchronous>, transform_indices = @transform_1, window_bounds = array<i64: 128, 128>}, {pipeline_mode = #tpu.pipeline_mode<synchronous>, transform_indices = @transform_2, window_bounds = array<i64: 128, 128>}, {pipeline_mode = #tpu.pipeline_mode<synchronous>, transform_indices = @transform_3, window_bounds = array<i64: 1, 128>}, {transform_indices = @transform_4, window_bounds = array<i64: 128, 128>}]} {
    %c0 = arith.constant 0 : index
    %c0_0 = arith.constant 0 : index
    %0 = vector.load %arg2[%c0, %c0_0] : memref<128x128xf32, #tpu.memory_space<vmem>>, vector<128x128xf32>
    %c0_1 = arith.constant 0 : index
    %c0_2 = arith.constant 0 : index
    %1 = vector.load %arg3[%c0_1, %c0_2] : memref<128x128xf32, #tpu.memory_space<vmem>>, vector<128x128xf32>
    %cst = arith.constant dense<0.000000e+00> : vector<128x128xf32>
    %2 = tpu.matmul %0, %1, %cst {dimension_numbers = #tpu.dot_dimension_numbers<[1], [0], [0], [1], [0, 0, 1, 1], [], []>} : vector<128x128xf32>, vector<128x128xf32>, vector<128x128xf32> -> vector<128x128xf32>
    %c0_3 = arith.constant 0 : index
    %c0_4 = arith.constant 0 : index
    %3 = vector.load %arg1[%c0_3, %c0_4] : memref<128x128xf32, #tpu.memory_space<vmem>>, vector<128x128xf32>
    %cst_5 = arith.constant dense<0.000000e+00> : vector<128x128xf32>
    %4 = tpu.matmul %3, %2, %cst_5 {dimension_numbers = #tpu.dot_dimension_numbers<[1], [0], [0], [1], [0, 0, 1, 1], [], []>} : vector<128x128xf32>, vector<128x128xf32>, vector<128x128xf32> -> vector<128x128xf32>
    %c0_6 = arith.constant 0 : index
    %c0_7 = arith.constant 0 : index
    %5 = vector.load %arg4[%c0_6, %c0_7] : memref<1x128xf32, #tpu.memory_space<vmem>>, vector<1x128xf32>
    %6 = vector.broadcast %5 : vector<1x128xf32> to vector<128x128xf32>
    %7 = arith.addf %4, %6 : vector<128x128xf32>
    %cst_8 = arith.constant 5.000000e-01 : f32
    %8 = vector.broadcast %cst_8 : f32 to vector<128x128xf32>
    %9 = arith.mulf %8, %7 : vector<128x128xf32>
    %cst_9 = arith.constant 0.707106769 : f32
    %10 = vector.broadcast %cst_9 : f32 to vector<128x128xf32>
    %11 = arith.mulf %7, %10 : vector<128x128xf32>
    %12 = math.erf %11 : vector<128x128xf32>
    %cst_10 = arith.constant 1.000000e+00 : f32
    %13 = vector.broadcast %cst_10 : f32 to vector<128x128xf32>
    %14 = arith.addf %13, %12 : vector<128x128xf32>
    %15 = arith.mulf %9, %14 : vector<128x128xf32>
    %c128_i32 = arith.constant 128 : i32
    %16 = arith.muli %arg0, %c128_i32 : i32
    %17 = tpu.assume_multiple %16, 8 : i32
    %18 = arith.index_cast %17 : i32 to index
    %c0_11 = arith.constant 0 : index
    %19 = vector.load %arg2[%18, %c0_11] : memref<128x128xf32, #tpu.memory_space<vmem>>, vector<128x128xf32>
    %20 = arith.addf %15, %19 : vector<128x128xf32>
    %c0_12 = arith.constant 0 : index
    %c0_13 = arith.constant 0 : index
    %21 = vector.load %arg5[%c0_12, %c0_13] : memref<128x128xf32, #tpu.memory_space<vmem>>, vector<128x128xf32>
    tpu.vector_store %arg5[%c0_12, %c0_13], %20 {strides = array<i32>} : memref<128x128xf32, #tpu.memory_space<vmem>>, vector<128x128xf32>,
    return
  }
  func.func @transform_0(%arg0: i32) -> (i32, i32) {
    %c0_i32 = arith.constant 0 : i32
    %c0_i32_0 = arith.constant 0 : i32
    return %arg0, %c0_i32 : i32, i32
  }
  func.func @transform_1(%arg0: i32) -> (i32, i32) {
    %c0_i32 = arith.constant 0 : i32
    %c0_i32_0 = arith.constant 0 : i32
    %c0_i32_1 = arith.constant 0 : i32
    return %c0_i32, %c0_i32_0 : i32, i32
  }
  func.func @transform_2(%arg0: i32) -> (i32, i32) {
    %c0_i32 = arith.constant 0 : i32
    %c0_i32_0 = arith.constant 0 : i32
    %c0_i32_1 = arith.constant 0 : i32
    return %c0_i32, %c0_i32_0 : i32, i32
  }
  func.func @transform_3(%arg0: i32) -> (i32, i32) {
    %c0_i32 = arith.constant 0 : i32
    %c0_i32_0 = arith.constant 0 : i32
    %c0_i32_1 = arith.constant 0 : i32
    return %c0_i32, %c0_i32_0 : i32, i32
  }
  func.func @transform_4(%arg0: i32) -> (i32, i32) {
    %c0_i32 = arith.constant 0 : i32
    %c0_i32_0 = arith.constant 0 : i32
    return %arg0, %c0_i32 : i32, i32
  }
}

</mosaic_0001>

<bundles_post_ra>
// kernel: tpu_custom_call.1
= control target key start
LH: loop header
LB: loop body
LE: loop exit
PB: predicated region body
PF: predicated region fallthrough
CT: control target
= control target key end

     0   :  { %9 = vsyncpa [#allocation3], 0  ;;  %s1021_s0 = inlined_call_operand.hbm [shape: f32[128,128], index: 0, kind: input, shape index: {}]   ;;  %s1022_s1 = inlined_call_operand.hbm [shape: f32[128,128], index: 1, kind: input, shape index: {}]   ;;  %s1023_s2 = inlined_call_operand.hbm [shape: f32[128,128], index: 2, kind: input, shape index: {}]   ;;  %s1024_s3 = inlined_call_operand.vmem [shape: f32[1,128], index: 3, kind: input, shape index: {}]   ;;  %s1025_s4 = inlined_call_operand.hbm [shape: f32[128,128], index: 4, kind: output, shape index: {}]  }
   0x1   :  { %10 = vsyncpa [#allocation6], 0 }
   0x2   :  { %11 = vsyncpa [#allocation4], 0  ;;  %s853_s15 = smov [#allocation5]   ;;  %s854_s17 = smov [#allocation2]  }
   0x3   :  { %s29_s16 = sshll.u32 %s853_s15, 4  ;;  %s17_s18 = sshll.u32 %s854_s17, 4  ;;  %s30_s16 = int_to_ptr.vmem [resolvable:$true] %s29_s16  ;;  %s18_s18 = int_to_ptr.vmem [resolvable:$true] %s17_s18 }
   0x4   :  { %s775_s19 = scalar_lea.vmem %s30_s16, 2048  ;;  %p780_p1 = scmp.lt.s32.totalorder %s30_s16, %s30_s16 }
   0x5   :  { %p776_p0 = scmp.ne.s32.totalorder %s30_s16, %s775_s19  ;;  %p781_p2 = scmp.lt.s32.totalorder %s775_s19, %s775_s19 }
   0x7   :  { %p782_p3 = por %p781_p2, %p780_p1 }
   0x9   :  { %p783_p4 = pnand %p782_p3, %p776_p0 }
   0xb   :  { %786 = shalt.err (!%p783_p4)
}
   0xc   :  { %s855_s20 = smov 128   ;;  %s856_s21 = smov 8  }
   0xd   :  { %35 = dma.hbm_to_vmem [thread:$0]  %s1022_s1, 2048, %s30_s16, [#allocation6], %s855_s20, %s855_s20, %s856_s21  }
   0xe   :  { %s795_s24 = scalar_lea.vmem %s18_s18, 2048  ;;  %p800_p6 = scmp.lt.s32.totalorder %s18_s18, %s18_s18 }
   0xf   :  { %p796_p5 = scmp.ne.s32.totalorder %s18_s18, %s795_s24  ;;  %p801_p7 = scmp.lt.s32.totalorder %s795_s24, %s795_s24 }
  0x11   :  { %p802_p8 = por %p801_p7, %p800_p6 }
  0x13   :  { %p803_p9 = pnand %p802_p8, %p796_p5 }
  0x15   :  { %806 = shalt.err (!%p803_p9)
}
  0x16   :  { %23 = dma.hbm_to_vmem [thread:$0]  %s1021_s0, 2048, %s18_s18, [#allocation3], %s855_s20, %s855_s20, %s856_s21  }
  0x17   :  { %s857_s27 = smov [#allocation7]  }
  0x18   :  { %s41_s28 = sshll.u32 %s857_s27, 4  ;;  %s42_s28 = int_to_ptr.vmem [resolvable:$true] %s41_s28 }
  0x19   :  { %s815_s29 = scalar_lea.vmem %s42_s28, 2048  ;;  %p820_p11 = scmp.lt.s32.totalorder %s42_s28, %s42_s28 }
  0x1a   :  { %p816_p10 = scmp.ne.s32.totalorder %s42_s28, %s815_s29  ;;  %p821_p12 = scmp.lt.s32.totalorder %s815_s29, %s815_s29 }
  0x1c   :  { %p822_p13 = por %p821_p12, %p820_p11 }
  0x1e   :  { %p823_p0 = pnand %p822_p13, %p816_p10 }
  0x20   :  { %826 = shalt.err (!%p823_p0)
}
  0x21   :  { %47 = dma.hbm_to_vmem [thread:$0]  %s1023_s2, 2048, %s42_s28, [#allocation6], %s855_s20, %s855_s20, %s856_s21  }
  0x22   :  { %847 = dma.done.wait [#allocation3], 2048  }
  0x23   :  { %848 = vsyncadd [#allocation3], 4294965248 }
  0x24   :  { %849 = dma.done.wait [#allocation6], 4096  }
  0x25   :  { %850 = vsyncadd [#allocation6], 4294963200  ;;  %v90_v0 = vld [vmem:[#allocation7 + $0x78] sm:$0xff]  ;;  %v89_v1 = vld [vmem:[#allocation7 + $0x70] sm:$0xff] }
  0x26   :  { %617 = vmatprep.subr.mxu0 %v90_v0  ;;  %v88_v2 = vld [vmem:[#allocation7 + $0x68] sm:$0xff]  ;;  %v87_v3 = vld [vmem:[#allocation7 + $0x60] sm:$0xff]  ;;  %v86_v5 = vld [vmem:[#allocation7 + $0x58] sm:$0xff] }
  0x27   :  { %618 = vmatpush3.msra.mxu0 %v90_v0  ;;  %v902_v4 = vld [vmem:[#allocation5] sm:$0xff]  ;;  %v85_v6 = vld [vmem:[#allocation7 + $0x50] sm:$0xff]  ;;  %v84_v7 = vld [vmem:[#allocation7 + $0x48] sm:$0xff] }
  0x28   :  { %619 = vmatprep.subr.mxu0 %v89_v1  ;;  %649 = vmatprep.mubr.f32.mxu0 %v902_v4  ;;  %v83_v8 = vld [vmem:[#allocation7 + $0x40] sm:$0xff]  ;;  %v82_v9 = vld [vmem:[#allocation7 + $0x38] sm:$0xff]  ;;  %v81_v10 = vld [vmem:[#allocation7 + $0x30] sm:$0xff] }
  0x29   :  { %620 = vmatpush3.msra.mxu0 %v89_v1  ;;  %v80_v11 = vld [vmem:[#allocation7 + $0x28] sm:$0xff]  ;;  %v79_v12 = vld [vmem:[#allocation7 + $0x20] sm:$0xff]  ;;  %v78_v13 = vld [vmem:[#allocation7 + $0x18] sm:$0xff] }
  0x2a   :  { %621 = vmatprep.subr.mxu0 %v88_v2  ;;  %v77_v14 = vld [vmem:[#allocation7 + $0x10] sm:$0xff]  ;;  %v76_v15 = vld [vmem:[#allocation7 + $0x8] sm:$0xff]  ;;  %v75_v16 = vld [vmem:[#allocation7] sm:$0xff] }
  0x2b   :  { %622 = vmatpush3.msra.mxu0 %v88_v2  ;;  %v905_v17 = vld [vmem:[#allocation5 + $0x8] sm:$0xff]  ;;  %v907_v18 = vld [vmem:[#allocation5 + $0x10] sm:$0xff]  ;;  %v911_v19 = vld [vmem:[#allocation5 + $0x18] sm:$0xff] }
  0x2c   :  { %623 = vmatprep.subr.mxu0 %v87_v3  ;;  %v913_v20 = vld [vmem:[#allocation5 + $0x20] sm:$0xff]  ;;  %v917_v21 = vld [vmem:[#allocation5 + $0x28] sm:$0xff]  ;;  %v919_v22 = vld [vmem:[#allocation5 + $0x30] sm:$0xff] }
  0x2d   :  { %624 = vmatpush3.msra.mxu0 %v87_v3  ;;  %v923_v23 = vld [vmem:[#allocation5 + $0x38] sm:$0xff]  ;;  %v925_v24 = vld [vmem:[#allocation5 + $0x40] sm:$0xff]  ;;  %v929_v25 = vld [vmem:[#allocation5 + $0x48] sm:$0xff] }
  0x2e   :  { %625 = vmatprep.subr.mxu0 %v86_v5  ;;  %v931_v26 = vld [vmem:[#allocation5 + $0x50] sm:$0xff]  ;;  %v935_v27 = vld [vmem:[#allocation5 + $0x58] sm:$0xff]  ;;  %v937_v28 = vld [vmem:[#allocation5 + $0x60] sm:$0xff] }
  0x2f   :  { %626 = vmatpush3.msra.mxu0 %v86_v5  ;;  %v941_v29 = vld [vmem:[#allocation5 + $0x68] sm:$0xff]  ;;  %v943_v30 = vld [vmem:[#allocation5 + $0x70] sm:$0xff]  ;;  %v947_v31 = vld [vmem:[#allocation5 + $0x78] sm:$0xff] }
  0x30   :  { %627 = vmatprep.subr.mxu0 %v85_v6  ;;  %v236_v32 = vld [vmem:[#allocation2] sm:$0xff]  ;;  %v237_v49 = vld [vmem:[#allocation2 + $0x8] sm:$0xff]  ;;  %v238_v50 = vld [vmem:[#allocation2 + $0x10] sm:$0xff] }
  0x31   :  { %628 = vmatpush3.msra.mxu0 %v85_v6  ;;  %705 = vmatprep.mubr.f32.mxu1 %v236_v32  ;;  %v239_v51 = vld [vmem:[#allocation2 + $0x18] sm:$0xff]  ;;  %v240_v52 = vld [vmem:[#allocation2 + $0x20] sm:$0xff]  ;;  %v241_v53 = vld [vmem:[#allocation2 + $0x28] sm:$0xff] }
  0x32   :  { %629 = vmatprep.subr.mxu0 %v84_v7  ;;  %v242_v54 = vld [vmem:[#allocation2 + $0x30] sm:$0xff]  ;;  %v243_v55 = vld [vmem:[#allocation2 + $0x38] sm:$0xff]  ;;  %v244_v56 = vld [vmem:[#allocation2 + $0x40] sm:$0xff] }
  0x33   :  { %630 = vmatpush3.msra.mxu0 %v84_v7  ;;  %v245_v57 = vld [vmem:[#allocation2 + $0x48] sm:$0xff]  ;;  %v246_v58 = vld [vmem:[#allocation2 + $0x50] sm:$0xff]  ;;  %v247_v59 = vld [vmem:[#allocation2 + $0x58] sm:$0xff] }
  0x34   :  { %631 = vmatprep.subr.mxu0 %v83_v8  ;;  %v248_v60 = vld [vmem:[#allocation2 + $0x60] sm:$0xff]  ;;  %v249_v61 = vld [vmem:[#allocation2 + $0x68] sm:$0xff]  ;;  %v250_v62 = vld [vmem:[#allocation2 + $0x70] sm:$0xff] }
  0x35   :  { %632 = vmatpush3.msra.mxu0 %v83_v8  ;;  %v251_v63 = vld [vmem:[#allocation2 + $0x78] sm:$0xff]  ;;  %v953_v0 = vld [vmem:[%s1024_s3] ss:$0 sm:$0xff]  ;;  %s858_s3 = smov [#allocation8]  }
  0x36   :  { %633 = vmatprep.subr.mxu0 %v82_v9  ;;  %s539_s5 = sshll.u32 %s858_s3, 4  ;;  %s540_s5 = int_to_ptr.vmem [resolvable:$true] %s539_s5 }
  0x37   :  { %634 = vmatpush3.msra.mxu0 %v82_v9  ;;  %s827_s6 = scalar_lea.vmem %s540_s5, 2048  ;;  %p832_p2 = scmp.lt.s32.totalorder %s540_s5, %s540_s5 }
  0x38   :  { %635 = vmatprep.subr.mxu0 %v81_v10  ;;  %p828_p1 = scmp.ne.s32.totalorder %s540_s5, %s827_s6  ;;  %p833_p3 = scmp.lt.s32.totalorder %s827_s6, %s827_s6 }
  0x39   :  { %636 = vmatpush3.msra.mxu0 %v81_v10 }
  0x3a   :  { %637 = vmatprep.subr.mxu0 %v80_v11  ;;  %p834_p4 = por %p833_p3, %p832_p2 }
  0x3b   :  { %638 = vmatpush3.msra.mxu0 %v80_v11 }
  0x3c   :  { %639 = vmatprep.subr.mxu0 %v79_v12  ;;  %p835_p5 = pnand %p834_p4, %p828_p1 }
  0x3d   :  { %640 = vmatpush3.msra.mxu0 %v79_v12 }
  0x3e   :  { %641 = vmatprep.subr.mxu0 %v78_v13 }
  0x3f   :  { %642 = vmatpush3.msra.mxu0 %v78_v13 }
  0x40   :  { %643 = vmatprep.subr.mxu0 %v77_v14 }
  0x41   :  { %644 = vmatpush3.msra.mxu0 %v77_v14 }
  0x42   :  { %645 = vmatprep.subr.mxu0 %v76_v15 }
  0x43   :  { %646 = vmatpush3.msra.mxu0 %v76_v15 }
  0x44   :  { %647 = vmatprep.subr.mxu0 %v75_v16 }
  0x45   :  { %648 = vmatpush3.msra.mxu0 %v75_v16 }
  0x46   :  { %650 = vmatmul.mubr.f32.vlgmr.msra.gmra.mxu0 %v905_v17 }
  0x47   :  { %652 = vmatprep.mubr.f32.mxu0 %v907_v18 }
  0x4a   :  { %653 = vmatmul.mubr.f32.gmra.mxu0 %v911_v19 }
  0x4b   :  { %655 = vmatprep.mubr.f32.mxu0 %v913_v20 }
  0x4e   :  { %656 = vmatmul.mubr.f32.gmra.mxu0 %v917_v21 }
  0x4f   :  { %658 = vmatprep.mubr.f32.mxu0 %v919_v22 }
  0x52   :  { %659 = vmatmul.mubr.f32.gmra.mxu0 %v923_v23 }
  0x53   :  { %661 = vmatprep.mubr.f32.mxu0 %v925_v24 }
  0x56   :  { %662 = vmatmul.mubr.f32.gmra.mxu0 %v929_v25 }
  0x57   :  { %664 = vmatprep.mubr.f32.mxu0 %v931_v26 }
  0x5a   :  { %665 = vmatmul.mubr.f32.gmra.mxu0 %v935_v27 }
  0x5b   :  { %667 = vmatprep.mubr.f32.mxu0 %v937_v28 }
  0x5e   :  { %668 = vmatmul.mubr.f32.gmra.mxu0 %v941_v29 }
  0x5f   :  { %670 = vmatprep.mubr.f32.mxu0 %v943_v30 }
  0x62   :  { %671 = vmatmul.mubr.f32.gmra.mxu0 %v947_v31 }
 0x106   :  { %v651_v33 = vpop.f32.mrf.mxu0 }
 0x108   :  { %v157_v34 = vpop.f32.mrf.mxu0 }
 0x10a   :  { %v654_v35 = vpop.f32.mrf.mxu0 }
 0x10c   :  { %v167_v36 = vpop.f32.mrf.mxu0 }
 0x10e   :  { %v657_v37 = vpop.f32.mrf.mxu0 }
 0x110   :  { %v177_v38 = vpop.f32.mrf.mxu0 }
 0x112   :  { %v660_v39 = vpop.f32.mrf.mxu0 }
 0x114   :  { %v187_v40 = vpop.f32.mrf.mxu0 }
 0x116   :  { %v663_v41 = vpop.f32.mrf.mxu0 }
 0x118   :  { %v197_v42 = vpop.f32.mrf.mxu0 }
 0x11a   :  { %v666_v43 = vpop.f32.mrf.mxu0 }
 0x11c   :  { %v207_v44 = vpop.f32.mrf.mxu0 }
 0x11e   :  { %v669_v45 = vpop.f32.mrf.mxu0 }
 0x120   :  { %v217_v46 = vpop.f32.mrf.mxu0 }
 0x122   :  { %v672_v47 = vpop.f32.mrf.mxu0 }
 0x123   :  { %673 = vmatprep.subr.mxu1 %v672_v47 }
 0x124   :  { %v227_v48 = vpop.f32.mrf.mxu0  ;;  %674 = vmatpush3.msra.mxu1 %v672_v47 }
 0x125   :  { %675 = vmatprep.subr.mxu1 %v227_v48 }
 0x126   :  { %676 = vmatpush3.msra.mxu1 %v227_v48 }
 0x127   :  { %677 = vmatprep.subr.mxu1 %v669_v45 }
 0x128   :  { %678 = vmatpush3.msra.mxu1 %v669_v45 }
 0x129   :  { %679 = vmatprep.subr.mxu1 %v217_v46 }
 0x12a   :  { %680 = vmatpush3.msra.mxu1 %v217_v46 }
 0x12b   :  { %681 = vmatprep.subr.mxu1 %v666_v43 }
 0x12c   :  { %682 = vmatpush3.msra.mxu1 %v666_v43 }
 0x12d   :  { %683 = vmatprep.subr.mxu1 %v207_v44 }
 0x12e   :  { %684 = vmatpush3.msra.mxu1 %v207_v44 }
 0x12f   :  { %685 = vmatprep.subr.mxu1 %v663_v41 }
 0x130   :  { %686 = vmatpush3.msra.mxu1 %v663_v41 }
 0x131   :  { %687 = vmatprep.subr.mxu1 %v197_v42 }
 0x132   :  { %688 = vmatpush3.msra.mxu1 %v197_v42 }
 0x133   :  { %689 = vmatprep.subr.mxu1 %v660_v39 }
 0x134   :  { %690 = vmatpush3.msra.mxu1 %v660_v39 }
 0x135   :  { %691 = vmatprep.subr.mxu1 %v187_v40 }
 0x136   :  { %692 = vmatpush3.msra.mxu1 %v187_v40 }
 0x137   :  { %693 = vmatprep.subr.mxu1 %v657_v37 }
 0x138   :  { %694 = vmatpush3.msra.mxu1 %v657_v37 }
 0x139   :  { %695 = vmatprep.subr.mxu1 %v177_v38 }
 0x13a   :  { %696 = vmatpush3.msra.mxu1 %v177_v38 }
 0x13b   :  { %697 = vmatprep.subr.mxu1 %v654_v35 }
 0x13c   :  { %698 = vmatpush3.msra.mxu1 %v654_v35 }
 0x13d   :  { %699 = vmatprep.subr.mxu1 %v167_v36 }
 0x13e   :  { %700 = vmatpush3.msra.mxu1 %v167_v36 }
 0x13f   :  { %701 = vmatprep.subr.mxu1 %v651_v33 }
 0x140   :  { %702 = vmatpush3.msra.mxu1 %v651_v33 }
 0x141   :  { %703 = vmatprep.subr.mxu1 %v157_v34 }
 0x142   :  { %704 = vmatpush3.msra.mxu1 %v157_v34 }
 0x143   :  { %706 = vmatmul.mubr.f32.vlgmr.msra.gmra.mxu1 %v237_v49 }
 0x144   :  { %708 = vmatprep.mubr.f32.mxu1 %v238_v50 }
 0x147   :  { %709 = vmatmul.mubr.f32.gmra.mxu1 %v239_v51 }
 0x148   :  { %711 = vmatprep.mubr.f32.mxu1 %v240_v52 }
 0x14b   :  { %712 = vmatmul.mubr.f32.gmra.mxu1 %v241_v53 }
 0x14c   :  { %714 = vmatprep.mubr.f32.mxu1 %v242_v54 }
 0x14f   :  { %715 = vmatmul.mubr.f32.gmra.mxu1 %v243_v55 }
 0x150   :  { %717 = vmatprep.mubr.f32.mxu1 %v244_v56 }
 0x153   :  { %718 = vmatmul.mubr.f32.gmra.mxu1 %v245_v57 }
 0x154   :  { %720 = vmatprep.mubr.f32.mxu1 %v246_v58 }
 0x157   :  { %721 = vmatmul.mubr.f32.gmra.mxu1 %v247_v59 }
 0x158   :  { %723 = vmatprep.mubr.f32.mxu1 %v248_v60 }
 0x15b   :  { %724 = vmatmul.mubr.f32.gmra.mxu1 %v249_v61 }
 0x15c   :  { %726 = vmatprep.mubr.f32.mxu1 %v250_v62 }
 0x15f   :  { %727 = vmatmul.mubr.f32.gmra.mxu1 %v251_v63 }
 0x203   :  { %v707_v1 = vpop.f32.mrf.mxu1 }
 0x204   :  { %v331_v2 = vadd.f32 %v707_v1, %v953_v0 }
 0x205   :  { %v325_v3 = vpop.f32.mrf.mxu1 }
 0x206   :  { %v421_v5 = vmul.f32 0.70710677, %v331_v2  ;;  %v326_v6 = vadd.f32 %v953_v0, %v325_v3  ;;  %v405_v45 = vmul.f32 0.5, %v331_v2 }
 0x207   :  { %v710_v7 = vpop.f32.mrf.mxu1 }
 0x208   :  { %735 = verf.f32 %v421_v5  ;;  %v420_v8 = vmul.f32 0.70710677, %v326_v6  ;;  %v341_v9 = vadd.f32 %v710_v7, %v953_v0  ;;  %v404_v49 = vmul.f32 0.5, %v326_v6 }
 0x209   :  { %v335_v10 = vpop.f32.mrf.mxu1 }
 0x20a   :  { %737 = verf.f32 %v420_v8  ;;  %v423_v11 = vmul.f32 0.70710677, %v341_v9  ;;  %v336_v12 = vadd.f32 %v953_v0, %v335_v10  ;;  %v407_v60 = vmul.f32 0.5, %v341_v9 }
 0x20b   :  { %v713_v13 = vpop.f32.mrf.mxu1 }
 0x20c   :  { %739 = verf.f32 %v423_v11  ;;  %v422_v14 = vmul.f32 0.70710677, %v336_v12  ;;  %v351_v15 = vadd.f32 %v713_v13, %v953_v0  ;;  %v406_v63 = vmul.f32 0.5, %v336_v12 }
 0x20d   :  { %v345_v16 = vpop.f32.mrf.mxu1 }
 0x20e   :  { %741 = verf.f32 %v422_v14  ;;  %v425_v32 = vmul.f32 0.70710677, %v351_v15  ;;  %v346_v33 = vadd.f32 %v953_v0, %v345_v16  ;;  %v409_v13 = vmul.f32 0.5, %v351_v15 }
 0x20f   :  { %v716_v34 = vpop.f32.mrf.mxu1 }
 0x210   :  { %743 = verf.f32 %v425_v32  ;;  %v424_v35 = vmul.f32 0.70710677, %v346_v33  ;;  %v962_v36 = vadd.f32 %v716_v34, %v953_v0  ;;  %v408_v32 = vmul.f32 0.5, %v346_v33 }
 0x211   :  { %v355_v37 = vpop.f32.mrf.mxu1 }
 0x212   :  { %745 = verf.f32 %v424_v35  ;;  %v427_v38 = vmul.f32 0.70710677, %v962_v36  ;;  %v966_v39 = vadd.f32 %v953_v0, %v355_v37 }
 0x213   :  { %v719_v40 = vpop.f32.mrf.mxu1 }
 0x214   :  { %747 = verf.f32 %v427_v38  ;;  %v426_v41 = vmul.f32 0.70710677, %v966_v39  ;;  %v970_v42 = vadd.f32 %v719_v40, %v953_v0 }
 0x215   :  { %v736_v43 = vpop.eup %735  ;;  %v365_v44 = vpop.f32.mrf.mxu1 }
 0x216   :  { %v453_v46 = vadd.f32 1.0, %v736_v43  ;;  %749 = verf.f32 %v426_v41  ;;  %v429_v47 = vmul.f32 0.70710677, %v970_v42  ;;  %v974_v50 = vadd.f32 %v953_v0, %v365_v44 }
 0x217   :  { %v738_v48 = vpop.eup %737  ;;  %v722_v51 = vpop.f32.mrf.mxu1 }
 0x218   :  { %v469_v52 = vmul.f32 %v453_v46, %v405_v45  ;;  %v452_v53 = vadd.f32 1.0, %v738_v48  ;;  %751 = verf.f32 %v429_v47  ;;  %v977_v54 = vadd.f32 %v722_v51, %v953_v0 }
 0x219   :  { %v740_v55 = vpop.eup %739  ;;  %v428_v56 = vmul.f32 0.70710677, %v974_v50  ;;  %v375_v57 = vpop.f32.mrf.mxu1  ;;  %v411_v45 = vmul.f32 0.5, %v962_v36 }
 0x21a   :  { %v503_v58 = vadd.f32 %v469_v52, %v905_v17  ;;  %v468_v59 = vmul.f32 %v452_v53, %v404_v49  ;;  %v455_v61 = vadd.f32 1.0, %v740_v55  ;;  %v431_v1 = vmul.f32 0.70710677, %v977_v54 }
 0x21b   :  { %v742_v62 = vpop.eup %741  ;;  %753 = verf.f32 %v428_v56  ;;  %v983_v2 = vadd.f32 %v953_v0, %v375_v57  ;;  %v725_v3 = vpop.f32.mrf.mxu1  ;;  %v410_v52 = vmul.f32 0.5, %v966_v39  ;;  %v413_v57 = vmul.f32 0.5, %v970_v42 }
 0x21c   :  { %519 = vst [vmem:[#allocation8 + $0x8] sm:$0xff] %v503_v58  ;;  %v502_v5 = vadd.f32 %v468_v59, %v902_v4  ;;  %v471_v6 = vmul.f32 %v455_v61, %v407_v60  ;;  %v454_v7 = vadd.f32 1.0, %v742_v62  ;;  %v987_v8 = vadd.f32 %v725_v3, %v953_v0 }
 0x21d   :  { %v744_v17 = vpop.eup %743  ;;  %755 = verf.f32 %v431_v1  ;;  %v430_v9 = vmul.f32 0.70710677, %v983_v2  ;;  %v385_v10 = vpop.f32.mrf.mxu1  ;;  %v412_v60 = vmul.f32 0.5, %v974_v50 }
 0x21e   :  { %518 = vst [vmem:[#allocation8] sm:$0xff] %v502_v5  ;;  %v505_v11 = vadd.f32 %v471_v6, %v911_v19  ;;  %v470_v12 = vmul.f32 %v454_v7, %v406_v63  ;;  %v457_v14 = vadd.f32 1.0, %v744_v17  ;;  %v433_v4 = vmul.f32 0.70710677, %v987_v8 }
 0x21f   :  { %v746_v16 = vpop.eup %745  ;;  %757 = verf.f32 %v430_v9  ;;  %v386_v34 = vadd.f32 %v953_v0, %v385_v10  ;;  %v728_v35 = vpop.f32.mrf.mxu1  ;;  %v414_v6 = vmul.f32 0.5, %v983_v2  ;;  %v417_v9 = vmul.f32 0.5, %v987_v8 }
 0x220   :  { %521 = vst [vmem:[#allocation8 + $0x18] sm:$0xff] %v505_v11  ;;  %v504_v37 = vadd.f32 %v470_v12, %v907_v18  ;;  %v473_v38 = vmul.f32 %v457_v14, %v409_v13  ;;  %v456_v40 = vadd.f32 1.0, %v746_v16  ;;  %v401_v41 = vadd.f32 %v728_v35, %v953_v0 }
 0x221   :  { %v748_v43 = vpop.eup %747  ;;  %759 = verf.f32 %v433_v4  ;;  %v432_v19 = vmul.f32 0.70710677, %v386_v34  ;;  %v395_v15 = vpop.f32.mrf.mxu1  ;;  %v416_v12 = vmul.f32 0.5, %v386_v34 }
 0x222   :  { %520 = vst [vmem:[#allocation8 + $0x10] sm:$0xff] %v504_v37  ;;  %v507_v33 = vadd.f32 %v473_v38, %v917_v21  ;;  %v472_v44 = vmul.f32 %v456_v40, %v408_v32  ;;  %v459_v46 = vadd.f32 1.0, %v748_v43  ;;  %v435_v48 = vmul.f32 0.70710677, %v401_v41 }
 0x223   :  { %v750_v47 = vpop.eup %749  ;;  %761 = verf.f32 %v432_v19  ;;  %v396_v18 = vadd.f32 %v953_v0, %v395_v15  ;;  %v419_v16 = vmul.f32 0.5, %v401_v41 }
 0x224   :  { %523 = vst [vmem:[#allocation8 + $0x28] sm:$0xff] %v507_v33  ;;  %v506_v49 = vadd.f32 %v472_v44, %v913_v20  ;;  %v475_v51 = vmul.f32 %v459_v46, %v411_v45  ;;  %v458_v53 = vadd.f32 1.0, %v750_v47  ;;  %763 = verf.f32 %v435_v48 }
 0x225   :  { %v752_v55 = vpop.eup %751  ;;  %v434_v56 = vmul.f32 0.70710677, %v396_v18  ;;  %v418_v35 = vmul.f32 0.5, %v396_v18 }
 0x226   :  { %522 = vst [vmem:[#allocation8 + $0x20] sm:$0xff] %v506_v49  ;;  %v509_v21 = vadd.f32 %v475_v51, %v923_v23  ;;  %v474_v36 = vmul.f32 %v458_v53, %v410_v52  ;;  %v461_v58 = vadd.f32 1.0, %v752_v55  ;;  %v415_v23 = vmul.f32 0.5, %v977_v54 }
 0x227   :  { %765 = verf.f32 %v434_v56 }
 0x228   :  { %v754_v59 = vpop.eup %753  ;;  %525 = vst [vmem:[#allocation8 + $0x38] sm:$0xff] %v509_v21  ;;  %v508_v0 = vadd.f32 %v474_v36, %v919_v22  ;;  %v477_v20 = vmul.f32 %v461_v58, %v413_v57 }
 0x229   :  { %v460_v39 = vadd.f32 1.0, %v754_v59 }
 0x22a   :  { %v756_v61 = vpop.eup %755  ;;  %524 = vst [vmem:[#allocation8 + $0x30] sm:$0xff] %v508_v0  ;;  %v511_v62 = vadd.f32 %v477_v20, %v929_v25 }
 0x22b   :  { %v476_v63 = vmul.f32 %v460_v39, %v412_v60  ;;  %v463_v1 = vadd.f32 1.0, %v756_v61 }
 0x22c   :  { %v758_v3 = vpop.eup %757  ;;  %527 = vst [vmem:[#allocation8 + $0x48] sm:$0xff] %v511_v62 }
 0x22d   :  { %v510_v42 = vadd.f32 %v476_v63, %v925_v24  ;;  %v479_v5 = vmul.f32 %v463_v1, %v415_v23  ;;  %v462_v22 = vadd.f32 1.0, %v758_v3 }
 0x22e   :  { %v760_v7 = vpop.eup %759 }
 0x22f   :  { %526 = vst [vmem:[#allocation8 + $0x40] sm:$0xff] %v510_v42  ;;  %v513_v50 = vadd.f32 %v479_v5, %v935_v27  ;;  %v478_v17 = vmul.f32 %v462_v22, %v414_v6  ;;  %v465_v25 = vadd.f32 1.0, %v760_v7 }
 0x230   :  { %v762_v10 = vpop.eup %761 }
 0x231   :  { %529 = vst [vmem:[#allocation8 + $0x58] sm:$0xff] %v513_v50  ;;  %v512_v54 = vadd.f32 %v478_v17, %v931_v26  ;;  %v481_v11 = vmul.f32 %v465_v25, %v417_v9  ;;  %v464_v13 = vadd.f32 1.0, %v762_v10  ;;  %v764_v24 = vpop.eup %763 }
 0x232   :  { %v467_v32 = vadd.f32 1.0, %v764_v24 }
 0x233   :  { %528 = vst [vmem:[#allocation8 + $0x50] sm:$0xff] %v512_v54  ;;  %v515_v2 = vadd.f32 %v481_v11, %v941_v29  ;;  %v480_v14 = vmul.f32 %v464_v13, %v416_v12 }
 0x234   :  { %v766_v4 = vpop.eup %765  ;;  %v483_v8 = vmul.f32 %v467_v32, %v419_v16 }
 0x235   :  { %531 = vst [vmem:[#allocation8 + $0x68] sm:$0xff] %v515_v2  ;;  %v514_v27 = vadd.f32 %v480_v14, %v937_v28  ;;  %v466_v37 = vadd.f32 1.0, %v766_v4 }
 0x236   :  { %v517_v26 = vadd.f32 %v483_v8, %v947_v31 }
 0x237   :  { %530 = vst [vmem:[#allocation8 + $0x60] sm:$0xff] %v514_v27  ;;  %v482_v34 = vmul.f32 %v466_v37, %v418_v35 }
 0x238   :  { %533 = vst [vmem:[#allocation8 + $0x78] sm:$0xff] %v517_v26 }
 0x239   :  { %v516_v38 = vadd.f32 %v482_v34, %v943_v30 }
 0x23b   :  { %532 = vst [vmem:[#allocation8 + $0x70] sm:$0xff] %v516_v38 }
 0x23c   :  { %838 = shalt.err (!%p835_p5)
}
 0x23d   :  { %545 = dma.vmem_to_hbm [thread:$0]  %s540_s5, 2048, %s1025_s4, [#allocation4], %s855_s20, %s855_s20, %s856_s21  }
 0x23e   :  { %851 = dma.done.wait [#allocation4], 2048  }
 0x23f   :  { %852 = vsyncadd [#allocation4], 4294965248 }
 0x240   :  { %549 = vsyncpa [#allocation3], 1 }
 0x241   :  { %550 = vsyncpa [#allocation6], 1 }
 0x242   :  { %551 = vsyncpa [#allocation4], 1 }

</bundles_post_ra>
